<compile_context>
chip_gen: v7x
topology: tpu7x:2x2x1
jax: 0.10.0
libtpu: 0.0.40
codegen_flags: <defaults>
</compile_context>

<pallas_src>
import math
from functools import partial

import jax
import jax.numpy as jnp
from jax.experimental import pallas as pl
from jax.experimental.pallas import tpu as pltpu


def actor_kernel(x_ref, w1_ref, b1_ref, w2_ref, b2_ref, mask_ref, o_ref, *, out_dim):
    # Layer 1: Linear + ReLU  (MXU matmul, f32 accumulate)
    x = x_ref[...]
    h = jnp.dot(x, w1_ref[...], preferred_element_type=jnp.float32) + b1_ref[...]
    h = jnp.maximum(h, 0.0)

    # Layer 2: Linear + ReLU (matches the PyTorch module: ReLU *before* softmax)
    y = jnp.dot(h.astype(w2_ref.dtype), w2_ref[...],
                preferred_element_type=jnp.float32) + b2_ref[...]
    y = jnp.maximum(y, 0.0)

    # Additive lane mask: 0 on real action lanes, -1e30 on the zero-padded lanes,
    # applied AFTER the ReLU so padded lanes contribute nothing to the softmax.
    y = y + mask_ref[...]

    # Numerically stable softmax over the last (lane) dim.
    m = jnp.max(y, axis=-1, keepdims=True)
    e = jnp.exp(y - m)
    denom = jnp.sum(e, axis=-1, keepdims=True)
    # EUP approximate reciprocal + one Newton step (~1e-6 relative error).
    inv = pl.reciprocal(denom, approx=True)
    inv = inv * (2.0 - denom * inv)
    probs = e * inv

    # Store only the real action lanes (o_ref block is (TB, out_dim)); the masked
    # partial store is trivial next to the 32x HBM-writeback saving.
    o_ref[...] = probs[:, :out_dim].astype(o_ref.dtype)


def _round_up(x, m):
    return (x + m - 1) // m * m


def prepare_actor_params(w1, b1, w2, b2, *, use_bf16=False):
    """One-time padding/cast of the (tiny) weights, biases and softmax lane mask.

    Call once after init / each optimizer step; actor_forward only touches the
    activation path per call.
    """
    in_dim, hid = w1.shape
    assert w2.shape[0] == hid
    out_dim = w2.shape[1]

    HP = _round_up(hid, 128)
    OP = _round_up(out_dim, 128)
    cdt = jnp.bfloat16 if use_bf16 else jnp.float32

    w1_p = jnp.zeros((in_dim, HP), cdt).at[:, :hid].set(w1.astype(cdt))
    b1_p = jnp.zeros((1, HP), jnp.float32).at[:, :hid].set(
        jnp.reshape(b1, (1, hid)).astype(jnp.float32))
    w2_p = jnp.zeros((HP, OP), cdt).at[:hid, :out_dim].set(w2.astype(cdt))
    b2_p = jnp.zeros((1, OP), jnp.float32).at[:, :out_dim].set(
        jnp.reshape(b2, (1, out_dim)).astype(jnp.float32))
    mask_p = jnp.where(jnp.arange(OP)[None, :] < out_dim,
                       0.0, -1e30).astype(jnp.float32)

    return dict(w1=w1_p, b1=b1_p, w2=w2_p, b2=b2_p, mask=mask_p,
                in_dim=in_dim, hid=hid, out_dim=out_dim,
                HP=HP, OP=OP, dtype=cdt)


def actor_forward(state, params, *, block_b=2048):
    """state: (B, input_dim). Returns (B, output_dim) softmax probabilities (f32).

    block_b: batch tile size. Defaults to 2048 (safe on v5e's 16 MiB scoped-VMEM
    default); cap ~4096 on v7x (64 MiB physical VMEM), go 8K-16K on v6e.
    """
    B, in_dim = state.shape
    assert in_dim == params["in_dim"]
    hid, out_dim = params["hid"], params["out_dim"]
    HP, OP = params["HP"], params["OP"]
    cdt = params["dtype"]
    itemsize = jnp.dtype(cdt).itemsize

    # Sublane granule: bf16 packs (16,128) per vreg, f32 packs (8,128).
    sub = 16 if cdt == jnp.bfloat16 else 8
    Bp = _round_up(B, sub)
    TB = min(_round_up(min(block_b, Bp), sub), Bp)
    # Prefer >= 2 grid steps when feasible so the "parallel" batch axis can shard
    # across both TensorCores on v7x (harmless on v5e/v6e).
    if Bp >= 2 * sub and pl.cdiv(Bp, TB) < 2:
        TB = _round_up(pl.cdiv(Bp, 2), sub)
    grid = pl.cdiv(Bp, TB)   # ragged final block allowed; OOB rows are dropped.

    # Per-call activation prep only (no weight padding here).
    x_p = state.astype(cdt)
    if Bp != B:
        x_p = jnp.pad(x_p, ((0, Bp - B), (0, 0)))

    # Advisory cost with the TRUE (unpadded) dims.
    cost = pl.CostEstimate(
        flops=2 * B * (in_dim * hid + hid * out_dim),
        transcendentals=B * out_dim,           # exp (+ one cheap reciprocal/row)
        bytes_accessed=(B * in_dim * itemsize
                        + (in_dim * hid + hid * out_dim) * itemsize
                        + (hid + out_dim) * 4
                        + B * out_dim * 4),
    )

    # VMEM budget: double-buffered IO tiles + f32 intermediates + resident weights.
    weight_bytes = ((in_dim * HP + HP * OP) * itemsize + (HP + 2 * OP) * 4)
    vmem_need = (2 * TB * in_dim * itemsize        # input tile, double-buffered
                 + 2 * TB * out_dim * 4            # output tile, double-buffered
                 + 6 * TB * max(HP, OP) * 4        # h / y / e f32 intermediates
                 + 2 * weight_bytes)
    vmem_limit = int(min(max(vmem_need + (4 << 20), 16 << 20), 48 << 20))

    out_p = pl.pallas_call(
        partial(actor_kernel, out_dim=out_dim),
        out_shape=jax.ShapeDtypeStruct((Bp, out_dim), jnp.float32),
        grid=(grid,),
        in_specs=[
            pl.BlockSpec((TB, in_dim), lambda i: (i, 0)),   # per-tile rows
            pl.BlockSpec((in_dim, HP), lambda i: (0, 0)),   # weights resident
            pl.BlockSpec((1, HP), lambda i: (0, 0)),
            pl.BlockSpec((HP, OP), lambda i: (0, 0)),
            pl.BlockSpec((1, OP), lambda i: (0, 0)),
            pl.BlockSpec((1, OP), lambda i: (0, 0)),        # additive lane mask
        ],
        out_specs=pl.BlockSpec((TB, out_dim), lambda i: (i, 0)),
        compiler_params=pltpu.CompilerParams(
            dimension_semantics=("parallel",),
            vmem_limit_bytes=vmem_limit),
        cost_estimate=cost,
    )(x_p, params["w1"], params["b1"], params["w2"], params["b2"], params["mask"])

    return out_p if Bp == B else out_p[:B]


def xavier_uniform(key, fan_in, fan_out, dtype=jnp.float32):
    # matches torch.nn.init.xavier_uniform_ (gain=1)
    limit = math.sqrt(6.0 / (fan_in + fan_out))
    return jax.random.uniform(key, (fan_in, fan_out), dtype=dtype,
                              minval=-limit, maxval=limit)


def _reference(state, w1, b1, w2, b2):
    h = jnp.maximum(state @ w1 + b1, 0.0)
    y = jnp.maximum(h @ w2 + b2, 0.0)
    return jax.nn.softmax(y, axis=-1)


if __name__ == "__main__":
    # Small shapes consistent with the module: batch=8, input_dim=16,
    # hidden_dim=32, output_dim=4 (discrete action logits -> softmax probs).
    B, input_dim, hidden_dim, output_dim = 8, 16, 32, 4

    key = jax.random.PRNGKey(0)
    k_state, k_w1, k_w2, k_big = jax.random.split(key, 4)

    state = jax.random.normal(k_state, (B, input_dim), dtype=jnp.float32)

    # Deterministic Xavier init, zero biases (as in init_weights()).
    w1 = xavier_uniform(k_w1, input_dim, hidden_dim)            # (in, hid)
    b1 = jnp.zeros((1, hidden_dim), dtype=jnp.float32)
    w2 = xavier_uniform(k_w2, hidden_dim, output_dim)           # (hid, out)
    b2 = jnp.zeros((1, output_dim), dtype=jnp.float32)

    # One-time weight prep (padding/cast hoisted out of the per-call path).
    params = prepare_actor_params(w1, b1, w2, b2)

    out = jax.block_until_ready(actor_forward(state, params))
    ref = _reference(state, w1, b1, w2, b2)
    assert out.shape == (B, output_dim)
    assert jnp.allclose(out, ref, atol=1e-4, rtol=1e-4)
    assert jnp.allclose(jnp.sum(out, axis=-1), 1.0, atol=1e-4)

    # Larger ragged batch: default block_b exercises the 2-way megacore split
    # (TB=136, grid=2); block_b=128 exercises the ragged last block (grid=3).
    B2 = 272
    state2 = jax.random.normal(k_big, (B2, input_dim), dtype=jnp.float32)
    ref2 = _reference(state2, w1, b1, w2, b2)

    out2a = jax.block_until_ready(actor_forward(state2, params))
    assert out2a.shape == (B2, output_dim)
    assert jnp.allclose(out2a, ref2, atol=1e-4, rtol=1e-4)

    out2b = jax.block_until_ready(actor_forward(state2, params, block_b=128))
    assert out2b.shape == (B2, output_dim)
    assert jnp.allclose(out2b, ref2, atol=1e-4, rtol=1e-4)

    # TODO(synk): self.mean (extra nn.Linear) and the Adam optimizer are defined
    # in __init__ but never used in forward(); intentionally not implemented.
    print("KERNEL_OK")
</pallas_src>

<mosaic_0001>
module attributes {stable_mosaic.version = 11 : i64} {
  func.func @actor_kernel(%arg0: i32, %arg1: memref<8x16xf32, #tpu.memory_space<vmem>>, %arg2: memref<16x128xf32, #tpu.memory_space<vmem>>, %arg3: memref<1x128xf32, #tpu.memory_space<vmem>>, %arg4: memref<128x128xf32, #tpu.memory_space<vmem>>, %arg5: memref<1x128xf32, #tpu.memory_space<vmem>>, %arg6: memref<1x128xf32, #tpu.memory_space<vmem>>, %arg7: memref<8x4xf32, #tpu.memory_space<vmem>>) attributes {dimension_semantics = [#tpu.dimension_semantics<parallel>], iteration_bounds = array<i64: 1>, scalar_prefetch = 0 : i64, scratch_operands = 0 : i64, tpu.core_type = #tpu.core_type<tc>, window_params = [{transform_indices = @transform_0, window_bounds = array<i64: 8, 16>}, {pipeline_mode = #tpu.pipeline_mode<synchronous>, transform_indices = @transform_1, window_bounds = array<i64: 16, 128>}, {pipeline_mode = #tpu.pipeline_mode<synchronous>, transform_indices = @transform_2, window_bounds = array<i64: 1, 128>}, {pipeline_mode = #tpu.pipeline_mode<synchronous>, transform_indices = @transform_3, window_bounds = array<i64: 128, 128>}, {pipeline_mode = #tpu.pipeline_mode<synchronous>, transform_indices = @transform_4, window_bounds = array<i64: 1, 128>}, {pipeline_mode = #tpu.pipeline_mode<synchronous>, transform_indices = @transform_5, window_bounds = array<i64: 1, 128>}, {transform_indices = @transform_6, window_bounds = array<i64: 8, 4>}]} {
    %c0 = arith.constant 0 : index
    %c0_0 = arith.constant 0 : index
    %0 = vector.load %arg1[%c0, %c0_0] : memref<8x16xf32, #tpu.memory_space<vmem>>, vector<8x16xf32>
    %c0_1 = arith.constant 0 : index
    %c0_2 = arith.constant 0 : index
    %1 = vector.load %arg2[%c0_1, %c0_2] : memref<16x128xf32, #tpu.memory_space<vmem>>, vector<16x128xf32>
    %cst = arith.constant dense<0.000000e+00> : vector<8x128xf32>
    %2 = tpu.matmul %0, %1, %cst {dimension_numbers = #tpu.dot_dimension_numbers<[1], [0], [0], [1], [0, 0, 1, 1], [], []>} : vector<8x16xf32>, vector<16x128xf32>, vector<8x128xf32> -> vector<8x128xf32>
    %c0_3 = arith.constant 0 : index
    %c0_4 = arith.constant 0 : index
    %3 = vector.load %arg3[%c0_3, %c0_4] : memref<1x128xf32, #tpu.memory_space<vmem>>, vector<1x128xf32>
    %4 = vector.broadcast %3 : vector<1x128xf32> to vector<8x128xf32>
    %5 = arith.addf %2, %4 : vector<8x128xf32>
    %cst_5 = arith.constant 0.000000e+00 : f32
    %6 = vector.broadcast %cst_5 : f32 to vector<8x128xf32>
    %7 = arith.maximumf %5, %6 : vector<8x128xf32>
    %c0_6 = arith.constant 0 : index
    %c0_7 = arith.constant 0 : index
    %8 = vector.load %arg4[%c0_6, %c0_7] : memref<128x128xf32, #tpu.memory_space<vmem>>, vector<128x128xf32>
    %cst_8 = arith.constant dense<0.000000e+00> : vector<8x128xf32>
    %9 = tpu.matmul %7, %8, %cst_8 {dimension_numbers = #tpu.dot_dimension_numbers<[1], [0], [0], [1], [0, 0, 1, 1], [], []>} : vector<8x128xf32>, vector<128x128xf32>, vector<8x128xf32> -> vector<8x128xf32>
    %c0_9 = arith.constant 0 : index
    %c0_10 = arith.constant 0 : index
    %10 = vector.load %arg5[%c0_9, %c0_10] : memref<1x128xf32, #tpu.memory_space<vmem>>, vector<1x128xf32>
    %11 = vector.broadcast %10 : vector<1x128xf32> to vector<8x128xf32>
    %12 = arith.addf %9, %11 : vector<8x128xf32>
    %cst_11 = arith.constant 0.000000e+00 : f32
    %13 = vector.broadcast %cst_11 : f32 to vector<8x128xf32>
    %14 = arith.maximumf %12, %13 : vector<8x128xf32>
    %c0_12 = arith.constant 0 : index
    %c0_13 = arith.constant 0 : index
    %15 = vector.load %arg6[%c0_12, %c0_13] : memref<1x128xf32, #tpu.memory_space<vmem>>, vector<1x128xf32>
    %16 = vector.broadcast %15 : vector<1x128xf32> to vector<8x128xf32>
    %17 = arith.addf %14, %16 : vector<8x128xf32>
    %cst_14 = arith.constant dense<0xFF800000> : vector<8xf32>
    %18 = vector.multi_reduction <maximumf>, %17, %cst_14 [1] : vector<8x128xf32> to vector<8xf32>
    %19 = vector.shape_cast %18 : vector<8xf32> to vector<8x1xf32>
    %20 = vector.broadcast %19 : vector<8x1xf32> to vector<8x128xf32>
    %21 = arith.subf %17, %20 : vector<8x128xf32>
    %22 = math.exp %21 : vector<8x128xf32>
    %cst_15 = arith.constant dense<0.000000e+00> : vector<8xf32>
    %23 = vector.multi_reduction <add>, %22, %cst_15 [1] : vector<8x128xf32> to vector<8xf32>
    %24 = vector.shape_cast %23 : vector<8xf32> to vector<8x1xf32>
    %25 = tpu.reciprocal %24 {approx = true} : vector<8x1xf32> -> vector<8x1xf32>
    %26 = arith.mulf %24, %25 : vector<8x1xf32>
    %cst_16 = arith.constant 2.000000e+00 : f32
    %27 = vector.broadcast %cst_16 : f32 to vector<8x1xf32>
    %28 = arith.subf %27, %26 : vector<8x1xf32>
    %29 = arith.mulf %25, %28 : vector<8x1xf32>
    %30 = vector.broadcast %29 : vector<8x1xf32> to vector<8x128xf32>
    %31 = arith.mulf %22, %30 : vector<8x128xf32>
    %32 = vector.extract_strided_slice %31 {offsets = [0, 0], sizes = [8, 4], strides = [1, 1]} : vector<8x128xf32> to vector<8x4xf32>
    %c0_17 = arith.constant 0 : index
    %c0_18 = arith.constant 0 : index
    %33 = vector.load %arg7[%c0_17, %c0_18] : memref<8x4xf32, #tpu.memory_space<vmem>>, vector<8x4xf32>
    tpu.vector_store %arg7[%c0_17, %c0_18], %32 {strides = array<i32>} : memref<8x4xf32, #tpu.memory_space<vmem>>, vector<8x4xf32>,
    return
  }
  func.func @transform_0(%arg0: i32) -> (i32, i32) {
    %c0_i32 = arith.constant 0 : i32
    %c0_i32_0 = arith.constant 0 : i32
    return %arg0, %c0_i32 : i32, i32
  }
  func.func @transform_1(%arg0: i32) -> (i32, i32) {
    %c0_i32 = arith.constant 0 : i32
    %c0_i32_0 = arith.constant 0 : i32
    %c0_i32_1 = arith.constant 0 : i32
    return %c0_i32, %c0_i32_0 : i32, i32
  }
  func.func @transform_2(%arg0: i32) -> (i32, i32) {
    %c0_i32 = arith.constant 0 : i32
    %c0_i32_0 = arith.constant 0 : i32
    %c0_i32_1 = arith.constant 0 : i32
    return %c0_i32, %c0_i32_0 : i32, i32
  }
  func.func @transform_3(%arg0: i32) -> (i32, i32) {
    %c0_i32 = arith.constant 0 : i32
    %c0_i32_0 = arith.constant 0 : i32
    %c0_i32_1 = arith.constant 0 : i32
    return %c0_i32, %c0_i32_0 : i32, i32
  }
  func.func @transform_4(%arg0: i32) -> (i32, i32) {
    %c0_i32 = arith.constant 0 : i32
    %c0_i32_0 = arith.constant 0 : i32
    %c0_i32_1 = arith.constant 0 : i32
    return %c0_i32, %c0_i32_0 : i32, i32
  }
  func.func @transform_5(%arg0: i32) -> (i32, i32) {
    %c0_i32 = arith.constant 0 : i32
    %c0_i32_0 = arith.constant 0 : i32
    %c0_i32_1 = arith.constant 0 : i32
    return %c0_i32, %c0_i32_0 : i32, i32
  }
  func.func @transform_6(%arg0: i32) -> (i32, i32) {
    %c0_i32 = arith.constant 0 : i32
    %c0_i32_0 = arith.constant 0 : i32
    return %arg0, %c0_i32 : i32, i32
  }
}

</mosaic_0001>

<bundles_post_ra>
// kernel: tpu_custom_call.1
= control target key start
LH: loop header
LB: loop body
LE: loop exit
PB: predicated region body
PF: predicated region fallthrough
CT: control target
= control target key end

     0   :  { %11 = vsyncpa [#allocation3], 0  ;;  %s541_s0 = inlined_call_operand.hbm [shape: f32[8,16], index: 0, kind: input, shape index: {}]   ;;  %s542_s1 = inlined_call_operand.hbm [shape: f32[16,128], index: 1, kind: input, shape index: {}]   ;;  %s543_s2 = inlined_call_operand.vmem [shape: f32[1,128], index: 2, kind: input, shape index: {}]   ;;  %s544_s3 = inlined_call_operand.hbm [shape: f32[128,128], index: 3, kind: input, shape index: {}]   ;;  %s545_s4 = inlined_call_operand.vmem [shape: f32[1,128], index: 4, kind: input, shape index: {}]   ;;  %s546_s5 = inlined_call_operand.vmem [shape: f32[1,128], index: 5, kind: input, shape index: {}]   ;;  %s547_s6 = inlined_call_operand.vmem [shape: f32[8,4], index: 6, kind: output, shape index: {}]  }
   0x1   :  { %12 = vsyncpa [#allocation5], 0  ;;  %s444_s21 = smov [#allocation4]   ;;  %s374_s25 = scalar_lea.hbm %s542_s1, 256 }
   0x2   :  { %s28_s22 = sshll.u32 %s444_s21, 4  ;;  %p375_p0 = scmp.ne.s32.totalorder %s542_s1, %s374_s25  ;;  %s29_s22 = int_to_ptr.vmem [resolvable:$true] %s28_s22 }
   0x3   :  { %p378_p1 = scmp.lt.u32.totalorder %s374_s25, %s542_s1 }
   0x5   :  { %p380_p2 = pnand %p378_p1, %p375_p0 }
   0x7   :  { %383 = shalt.err (!%p380_p2)
}
   0x8   :  { %s384_s30 = scalar_lea.vmem %s29_s22, 256  ;;  %p389_p4 = scmp.lt.s32.totalorder %s29_s22, %s29_s22 }
   0x9   :  { %p385_p3 = scmp.ne.s32.totalorder %s29_s22, %s384_s30  ;;  %p390_p5 = scmp.lt.s32.totalorder %s384_s30, %s384_s30 }
   0xb   :  { %p391_p6 = por %p390_p5, %p389_p4 }
   0xd   :  { %p392_p7 = pnand %p391_p6, %p385_p3 }
   0xf   :  { %395 = shalt.err (!%p392_p7)
}
  0x10   :  { %s445_s7 = smov 128   ;;  %s446_s8 = smov 8  }
  0x11   :  { %34 = dma.hbm_to_vmem [thread:$0]  %s542_s1, 256, %s29_s22, [#allocation5], %s445_s7, %s445_s7, %s446_s8  }
  0x12   :  { %s447_s11 = smov [#allocation2]   ;;  %s448_s13 = smov [#allocation6]  }
  0x13   :  { %s19_s12 = sshll.u32 %s447_s11, 4  ;;  %s42_s14 = sshll.u32 %s448_s13, 4  ;;  %s20_s12 = int_to_ptr.vmem [resolvable:$true] %s19_s12  ;;  %s43_s14 = int_to_ptr.vmem [resolvable:$true] %s42_s14 }
  0x14   :  { %s396_s17 = scalar_lea.hbm %s541_s0, 128 }
  0x15   :  { %p397_p8 = scmp.ne.s32.totalorder %s541_s0, %s396_s17  ;;  %p400_p9 = scmp.lt.u32.totalorder %s396_s17, %s541_s0 }
  0x17   :  { %p402_p10 = pnand %p400_p9, %p397_p8 }
  0x19   :  { %405 = shalt.err (!%p402_p10)
}
  0x1a   :  { %s406_s1 = scalar_lea.vmem %s20_s12, 128  ;;  %p411_p12 = scmp.lt.s32.totalorder %s20_s12, %s20_s12 }
  0x1b   :  { %p407_p11 = scmp.ne.s32.totalorder %s20_s12, %s406_s1  ;;  %p412_p13 = scmp.lt.s32.totalorder %s406_s1, %s406_s1 }
  0x1d   :  { %p413_p0 = por %p412_p13, %p411_p12 }
  0x1f   :  { %p414_p1 = pnand %p413_p0, %p407_p11 }
  0x21   :  { %417 = shalt.err (!%p414_p1)
}
  0x22   :  { %22 = dma.hbm_to_vmem [thread:$0]  %s541_s0, 128, %s20_s12, [#allocation3]  }
  0x23   :  { %s418_s26 = scalar_lea.hbm %s544_s3, 2048 }
  0x24   :  { %p419_p2 = scmp.ne.s32.totalorder %s544_s3, %s418_s26  ;;  %p422_p3 = scmp.lt.u32.totalorder %s418_s26, %s544_s3 }
  0x26   :  { %p424_p4 = pnand %p422_p3, %p419_p2 }
  0x28   :  { %427 = shalt.err (!%p424_p4)
}
  0x29   :  { %s428_s9 = scalar_lea.vmem %s43_s14, 2048  ;;  %p433_p6 = scmp.lt.s32.totalorder %s43_s14, %s43_s14 }
  0x2a   :  { %p429_p5 = scmp.ne.s32.totalorder %s43_s14, %s428_s9  ;;  %p434_p7 = scmp.lt.s32.totalorder %s428_s9, %s428_s9 }
  0x2c   :  { %p435_p8 = por %p434_p7, %p433_p6 }
  0x2e   :  { %p436_p9 = pnand %p435_p8, %p429_p5 }
  0x30   :  { %439 = shalt.err (!%p436_p9)
}
  0x31   :  { %48 = dma.hbm_to_vmem [thread:$0]  %s544_s3, 2048, %s43_s14, [#allocation5], %s445_s7, %s445_s7, %s446_s8  }
  0x32   :  { %440 = dma.done.wait [#allocation3], 128  }
  0x33   :  { %441 = vsyncadd [#allocation3], 4294967168 }
  0x34   :  { %442 = dma.done.wait [#allocation5], 2304  }
  0x35   :  { %443 = vsyncadd [#allocation5], 4294964992  ;;  %v449_v0 = vmov 0.0|0.0   ;;  %vm450_vm0 = vmmov 0   ;;  %v451_v1 = vmov 0.0   ;;  %v63_v2 = vld [vmem:[#allocation4] sm:$0xff] }
  0x36   :  { %335 = vmatprep.subr.bf16.mxu0 %v449_v0  ;;  %297 = vmatprep.mubr.msk.f32.mxu0 %vm450_vm0, %v451_v1  ;;  %v64_v3 = vld [vmem:[#allocation4 + $0x8] sm:$0xff]  ;;  %v147_v5 = vld [vmem:[#allocation6] sm:$0xff]  ;;  %v148_v6 = vld [vmem:[#allocation6 + $0x8] sm:$0xff]  ;;  %vm72_vm1 = vcmask 130048   ;;  %vm261_vm2 = vcmask 31744  }
  0x37   :  { %338 = vmatprep.subr.bf16.mxu1 %v449_v0  ;;  %332 = vmatprep.mubr.msk.f32.mxu1 %vm450_vm0, %v451_v1  ;;  %v336_v4 = vpack.c.bf16 %v64_v3, %v63_v2  ;;  %v149_v7 = vld [vmem:[#allocation6 + $0x10] sm:$0xff]  ;;  %v339_v8 = vpack.c.bf16 %v148_v6, %v147_v5  ;;  %v150_v9 = vld [vmem:[#allocation6 + $0x18] sm:$0xff]  ;;  %v62_v10 = vld [vmem:[#allocation2] sm:$0xff] }
  0x38   :  { %v342_v11 = vpack.c.bf16 %v150_v9, %v149_v7  ;;  %v151_v12 = vld [vmem:[#allocation6 + $0x20] sm:$0xff]  ;;  %v152_v13 = vld [vmem:[#allocation6 + $0x28] sm:$0xff]  ;;  %v153_v15 = vld [vmem:[#allocation6 + $0x30] sm:$0xff] }
  0x39   :  { %337 = vmatpush3.bf16.msra.mxu0 %v336_v4  ;;  %340 = vmatpush3.bf16.msra.mxu1 %v339_v8  ;;  %v345_v14 = vpack.c.bf16 %v152_v13, %v151_v12  ;;  %v154_v16 = vld [vmem:[#allocation6 + $0x38] sm:$0xff]  ;;  %v155_v18 = vld [vmem:[#allocation6 + $0x40] sm:$0xff]  ;;  %v156_v19 = vld [vmem:[#allocation6 + $0x48] sm:$0xff] }
  0x3a   :  { %341 = vmatprep.subr.bf16.mxu1 %v449_v0  ;;  %v348_v17 = vpack.c.bf16 %v154_v16, %v153_v15  ;;  %v351_v20 = vpack.c.bf16 %v156_v19, %v155_v18  ;;  %v157_v21 = vld [vmem:[#allocation6 + $0x50] sm:$0xff]  ;;  %v158_v22 = vld [vmem:[#allocation6 + $0x58] sm:$0xff]  ;;  %v159_v24 = vld [vmem:[#allocation6 + $0x60] sm:$0xff] }
  0x3b   :  { %v354_v23 = vpack.c.bf16 %v158_v22, %v157_v21  ;;  %v160_v25 = vld [vmem:[#allocation6 + $0x68] sm:$0xff]  ;;  %v161_v27 = vld [vmem:[#allocation6 + $0x70] sm:$0xff]  ;;  %v162_v28 = vld [vmem:[#allocation6 + $0x78] sm:$0xff] }
  0x3c   :  { %298 = vmatmul.mubr.msk.f32.vlgmr.msra.gmra.mrb[0].mxu0 %vm72_vm1, %v62_v10  ;;  %v357_v26 = vpack.c.bf16 %v160_v25, %v159_v24  ;;  %v360_v29 = vpack.c.bf16 %v162_v28, %v161_v27  ;;  %v269_v30 = vld [vmem:[%s543_s2] ss:$0 sm:$0xff] }
  0x3d   :  { %343 = vmatpush3.bf16.msra.mxu1 %v342_v11  ;;  %v271_v35 = vld [vmem:[%s545_s4] ss:$0 sm:$0xff] }
  0x3e   :  { %344 = vmatprep.subr.bf16.mxu1 %v449_v0  ;;  %v272_v39 = vld [vmem:[%s546_s5] ss:$0 sm:$0xff] }
  0x41   :  { %346 = vmatpush3.bf16.msra.mxu1 %v345_v14 }
  0x42   :  { %347 = vmatprep.subr.bf16.mxu1 %v449_v0 }
  0x45   :  { %349 = vmatpush3.bf16.msra.mxu1 %v348_v17 }
  0x46   :  { %350 = vmatprep.subr.bf16.mxu1 %v449_v0 }
  0x49   :  { %352 = vmatpush3.bf16.msra.mxu1 %v351_v20 }
  0x4a   :  { %353 = vmatprep.subr.bf16.mxu1 %v449_v0 }
  0x4d   :  { %355 = vmatpush3.bf16.msra.mxu1 %v354_v23 }
  0x4e   :  { %356 = vmatprep.subr.bf16.mxu1 %v449_v0 }
  0x51   :  { %358 = vmatpush3.bf16.msra.mxu1 %v357_v26 }
  0x52   :  { %359 = vmatprep.subr.bf16.mxu1 %v449_v0 }
  0x55   :  { %361 = vmatpush3.bf16.msra.mxu1 %v360_v29 }
 0x10f   :  { %v142_v31 = vpop.f32.mrb[0].mxu0 }
 0x110   :  { %v143_v32 = vadd.f32 %v269_v30, %v142_v31  ;;  %v299_v33 = vpop.f32.mrb[1].mxu0 }
 0x112   :  { %v146_v34 = vmax.f32 %v143_v32, 0.0 }
 0x114   :  { %333 = vmatmul.mubr.f32.vlgmr.msra.gmra.mrb[0].mxu1 %v146_v34 }
 0x1e7   :  { %v236_v36 = vpop.f32.mrb[0].mxu1 }
 0x1e8   :  { %v237_v37 = vadd.f32 %v271_v35, %v236_v36  ;;  %v334_v38 = vpop.f32.mrb[1].mxu1 }
 0x1ea   :  { %v240_v40 = vmax.f32 %v237_v37, 0.0 }
 0x1ec   :  { %v248_v41 = vadd.f32 %v272_v39, %v240_v40 }
 0x1ee   :  { %249 = vmax.xlane.f32.xlu0 %v248_v41 }
 0x27b   :  { %v250_v42 = vpop.xlane.xlu0 %249 }
 0x27c   :  { %v251_v43 = vsub.f32 %v248_v41, %v250_v42 }
 0x27e   :  { %v252_v44 = vmul.f32 1.442695, %v251_v43 }
 0x280   :  { %370 = vpow2.f32 %v252_v44 }
 0x28a   :  { %v371_v45 = vpop.eup %370 }
 0x28b   :  { %254 = vadd.xlane.f32.xlu0 %v371_v45 }
 0x318   :  { %v255_v46 = vpop.xlane.xlu0 %254 }
 0x319   :  { %372 = vrcp.f32 %v255_v46 }
 0x323   :  { %v373_v47 = vpop.eup %372 }
 0x324   :  { %v257_v48 = vmul.f32 %v373_v47, %v255_v46 }
 0x326   :  { %v258_v49 = vsub.f32 2.0, %v257_v48 }
 0x328   :  { %v259_v50 = vmul.f32 %v373_v47, %v258_v49 }
 0x32a   :  { %v260_v51 = vmul.f32 %v371_v45, %v259_v50 }
 0x32c   :  { %262 = vst.msk [vmem:[%s547_s6] sm:$0xff] %vm261_vm2, %v260_v51 }
 0x32d   :  { %267 = vsyncpa [#allocation3], 1 }
 0x32e   :  { %268 = vsyncpa [#allocation5], 1 }

</bundles_post_ra>
